<compile_context>
chip_gen: v5e
topology: v5e:2x2
jax: 0.10.0
libtpu: 0.0.40
codegen_flags: <defaults>
</compile_context>

<pallas_src>
import math
from functools import partial

import jax
import jax.numpy as jnp
import numpy as np
from jax import lax
from jax.experimental import pallas as pl
from jax.experimental.pallas import tpu as pltpu


# ----------------------------- helpers -------------------------------------


def _round_up(n, m):
    return ((n + m - 1) // m) * m


def _choose_seq_tile(L, max_tile=512):
    """Pick a sequence tile TL (multiple of 8) and the padded sequence length."""
    if L <= max_tile:
        tl = _round_up(L, 8)
        return tl, tl
    return max_tile, _round_up(L, max_tile)


def _pad_axis(a, axis, target):
    cur = a.shape[axis]
    if cur == target:
        return a
    pads = [(0, 0)] * a.ndim
    pads[axis] = (0, target - cur)
    return jnp.pad(a, pads)


def _sinusoidal_pe(length, dim):
    pos = jnp.arange(length, dtype=jnp.float32)[:, None]
    div = jnp.exp(jnp.arange(0, dim, 2, dtype=jnp.float32) * (-math.log(10000.0) / dim))
    pe = jnp.zeros((length, dim), jnp.float32)
    pe = pe.at[:, 0::2].set(jnp.sin(pos * div))
    pe = pe.at[:, 1::2].set(jnp.cos(pos * div))
    return pe


# ----------------------------- kernels -------------------------------------


def _token_emb_kernel(ids_ref, mask_ref, wemb_ref, pe_ref, out_ref):
    """t == 1 path. One grid step = one (batch, TL-token) tile.

    ids_ref  : (1, TL, 1) int32  token ids (padded positions carry id 0, mask 0)
    mask_ref : (1, TL, 1) f32
    wemb_ref : (V, D)     f32    folded table (W + type_emb[1]) * sqrt(D), VMEM-resident
    pe_ref   : (TL, D)    f32    sinusoidal PE tile for these positions
    out_ref  : (1, TL, D)
    """
    tl = out_ref.shape[1]
    v = wemb_ref.shape[0]
    ids = ids_ref[0]                                              # (TL, 1) int32
    # One-hot gather on the MXU (exact at HIGHEST precision). OOB ids select a
    # zero row; padding-row handling matches the reference fold.
    onehot = (ids == lax.broadcasted_iota(jnp.int32, (tl, v), 1)).astype(jnp.float32)
    emb = jnp.dot(onehot, wemb_ref[...],
                  preferred_element_type=jnp.float32,
                  precision=lax.Precision.HIGHEST)                # (TL, D)
    y = emb + pe_ref[...]
    y = jnp.where(mask_ref[0] == 0.0, 0.0, y)                     # masked_fill semantics
    out_ref[0] = y.astype(out_ref.dtype)


def _feat_emb_kernel(x_ref, pe_ref, mask_ref, out_ref, *, xscale):
    """t == 0 path. One grid step = one (batch, TL-row) tile.

    x_ref    : (1, TL, D)  input features (any float dtype; cast in-kernel)
    pe_ref   : (TL, D)     pe[:L] + type_emb[0] * sqrt(D)  (folded per call)
    mask_ref : (1, TL, 1)  f32
    out_ref  : (1, TL, D)
    """
    x = x_ref[0].astype(jnp.float32)
    y = x * xscale + pe_ref[...]
    y = jnp.where(mask_ref[0] == 0.0, 0.0, y)
    out_ref[0] = y.astype(out_ref.dtype)


# ----------------------------- wrappers ------------------------------------


def embdim_forward_tokens(token_ids, mask, wemb_scaled, pe):
    """t == 1: token-id inputs. token_ids: int [B, L], mask: [B, L]."""
    B, L = token_ids.shape
    V, D = wemb_scaled.shape
    TL, Lp = _choose_seq_tile(L)

    ids3 = _pad_axis(token_ids.astype(jnp.int32).reshape(B, L, 1), 1, Lp)
    mask3 = _pad_axis(mask.astype(jnp.float32).reshape(B, L, 1), 1, Lp)
    pe_pad = _pad_axis(pe[:L].astype(jnp.float32), 0, Lp)

    out = pl.pallas_call(
        _token_emb_kernel,
        out_shape=jax.ShapeDtypeStruct((B, Lp, D), jnp.float32),
        grid=(B, Lp // TL),
        in_specs=[
            pl.BlockSpec((1, TL, 1), lambda b, j: (b, j, 0)),
            pl.BlockSpec((1, TL, 1), lambda b, j: (b, j, 0)),
            pl.BlockSpec((V, D), lambda b, j: (0, 0)),   # constant index -> VMEM-resident
            pl.BlockSpec((TL, D), lambda b, j: (j, 0)),
        ],
        out_specs=pl.BlockSpec((1, TL, D), lambda b, j: (b, j, 0)),
        compiler_params=pltpu.CompilerParams(
            dimension_semantics=("parallel", "parallel")),
    )(ids3, mask3, wemb_scaled, pe_pad)
    return out[:, :L, :]


def embdim_forward_features(x, mask, pe_plus, xscale):
    """t == 0: float feature inputs. x: [B, L, D], mask: [B, L], pe_plus: [L, D]."""
    B, L, D = x.shape
    TL, Lp = _choose_seq_tile(L)

    x_pad = _pad_axis(x, 1, Lp)
    mask3 = _pad_axis(mask.astype(jnp.float32).reshape(B, L, 1), 1, Lp)
    pe_pad = _pad_axis(pe_plus.astype(jnp.float32), 0, Lp)

    out = pl.pallas_call(
        partial(_feat_emb_kernel, xscale=float(xscale)),
        out_shape=jax.ShapeDtypeStruct((B, Lp, D), jnp.float32),
        grid=(B, Lp // TL),
        in_specs=[
            pl.BlockSpec((1, TL, D), lambda b, j: (b, j, 0)),
            pl.BlockSpec((TL, D), lambda b, j: (j, 0)),
            pl.BlockSpec((1, TL, 1), lambda b, j: (b, j, 0)),
        ],
        out_specs=pl.BlockSpec((1, TL, D), lambda b, j: (b, j, 0)),
        compiler_params=pltpu.CompilerParams(
            dimension_semantics=("parallel", "parallel")),
    )(x_pad, pe_pad, mask3)
    return out[:, :L, :]


class EMBDimPallas:
    """Pallas port of EMBDim (embt='REL', drop=0.0)."""

    def __init__(self, dim, max_tochen_len=48, postlen=65, key=None):
        key = jax.random.PRNGKey(0) if key is None else key
        k_type, k_wemb, _k_pos = jax.random.split(key, 3)
        self.dim = dim
        self.xscale = math.sqrt(dim)
        # nn.Embedding default init ~ N(0, 1)
        self.type_emb = jax.random.normal(k_type, (2, dim), jnp.float32)
        wemb = jax.random.normal(k_wemb, (max_tochen_len, dim), jnp.float32)
        self.Wembedding = wemb.at[0].set(0.0)                 # padding_idx=0
        # One-time fold for the token path: (W + type_emb[1]) * sqrt(D).
        # Padding semantics preserved: the reference also adds type_emb[1] to the zero row.
        self.wemb_scaled = (self.Wembedding + self.type_emb[1]) * self.xscale
        # Pre-scaled type_emb[0] for the feature path (folded into the PE tile per call).
        self.type0_scaled = self.type_emb[0] * self.xscale
        self.max_pe_len = 4096
        self.pe = _sinusoidal_pe(self.max_pe_len, dim)        # RelPositionalEncoding table

    def __call__(self, x, t, mask=None):
        if t == 1:
            B, L = x.shape
            m = jnp.ones((B, L), jnp.float32) if mask is None else mask
            return embdim_forward_tokens(x, m, self.wemb_scaled, self.pe)
        if t == 0:
            B, L, _ = x.shape
            m = jnp.ones((B, L), jnp.float32) if mask is None else mask
            pe_plus = self.pe[:L] + self.type0_scaled[None, :]
            return embdim_forward_features(x, m, pe_plus, self.xscale)
        raise ValueError("t must be 0 or 1")


# ----------------------------- demo / check --------------------------------

if __name__ == "__main__":
    B, L, D, V = 2, 8, 32, 48
    model = EMBDimPallas(dim=D, max_tochen_len=V, key=jax.random.PRNGKey(0))

    key = jax.random.PRNGKey(0)
    k_tok, k_img, k_mask = jax.random.split(key, 3)
    tokens = jax.random.randint(k_tok, (B, L), 0, V, dtype=jnp.int32)
    tokens = tokens.at[:, -2:].set(0)                         # exercise padding_idx rows
    x_img = jax.random.normal(k_img, (B, L, D), jnp.float32)
    mask = (jax.random.uniform(k_mask, (B, L)) > 0.2).astype(jnp.float32)

    out_tok = jax.block_until_ready(model(tokens, t=1, mask=mask))
    out_img = jax.block_until_ready(model(x_img, t=0, mask=mask))

    # plain-JAX reference for sanity
    xscale = math.sqrt(D)
    pe = model.pe[:L]
    ref_tok = ((model.Wembedding[tokens] + model.type_emb[1]) * xscale + pe[None]) * mask[..., None]
    ref_img = ((x_img + model.type_emb[0]) * xscale + pe[None]) * mask[..., None]

    np.testing.assert_allclose(np.asarray(out_tok), np.asarray(ref_tok), rtol=1e-5, atol=1e-4)
    np.testing.assert_allclose(np.asarray(out_img), np.asarray(ref_img), rtol=1e-5, atol=1e-4)
    assert out_tok.shape == (B, L, D) and out_img.shape == (B, L, D)

    print("KERNEL_OK")
</pallas_src>

<mosaic_0001>
module attributes {stable_mosaic.version = 11 : i64} {
  func.func @_token_emb_kernel(%arg0: i32, %arg1: i32, %arg2: memref<1x8x1xi32, #tpu.memory_space<vmem>>, %arg3: memref<1x8x1xf32, #tpu.memory_space<vmem>>, %arg4: memref<48x32xf32, #tpu.memory_space<vmem>>, %arg5: memref<8x32xf32, #tpu.memory_space<vmem>>, %arg6: memref<1x8x32xf32, #tpu.memory_space<vmem>>) attributes {dimension_semantics = [#tpu.dimension_semantics<parallel>, #tpu.dimension_semantics<parallel>], iteration_bounds = array<i64: 2, 1>, scalar_prefetch = 0 : i64, scratch_operands = 0 : i64, tpu.core_type = #tpu.core_type<tc>, window_params = [{transform_indices = @transform_0, window_bounds = array<i64: 1, 8, 1>}, {transform_indices = @transform_1, window_bounds = array<i64: 1, 8, 1>}, {pipeline_mode = #tpu.pipeline_mode<synchronous>, transform_indices = @transform_2, window_bounds = array<i64: 48, 32>}, {transform_indices = @transform_3, window_bounds = array<i64: 8, 32>}, {transform_indices = @transform_4, window_bounds = array<i64: 1, 8, 32>}]} {
    %c0 = arith.constant 0 : index
    %c0_0 = arith.constant 0 : index
    %c0_1 = arith.constant 0 : index
    %0 = vector.load %arg2[%c0, %c0_0, %c0_1] : memref<1x8x1xi32, #tpu.memory_space<vmem>>, vector<1x8x1xi32>
    %1 = vector.shape_cast %0 : vector<1x8x1xi32> to vector<8x1xi32>
    %2 = tpu.iota {dimensions = array<i32: 1>} : vector<8x48xi32>
    %3 = vector.broadcast %1 : vector<8x1xi32> to vector<8x48xi32>
    %4 = arith.cmpi eq, %3, %2 : vector<8x48xi32>
    %5 = arith.extui %4 : vector<8x48xi1> to vector<8x48xi32>
    %6 = arith.sitofp %5 : vector<8x48xi32> to vector<8x48xf32>
    %c0_2 = arith.constant 0 : index
    %c0_3 = arith.constant 0 : index
    %7 = vector.load %arg4[%c0_2, %c0_3] : memref<48x32xf32, #tpu.memory_space<vmem>>, vector<48x32xf32>
    %cst = arith.constant dense<0.000000e+00> : vector<8x32xf32>
    %8 = tpu.matmul %6, %7, %cst {dimension_numbers = #tpu.dot_dimension_numbers<[1], [0], [0], [1], [0, 0, 1, 1], [], []>, precision = #tpu.contract_precision<fp32>} : vector<8x48xf32>, vector<48x32xf32>, vector<8x32xf32> -> vector<8x32xf32>
    %c0_4 = arith.constant 0 : index
    %c0_5 = arith.constant 0 : index
    %9 = vector.load %arg5[%c0_4, %c0_5] : memref<8x32xf32, #tpu.memory_space<vmem>>, vector<8x32xf32>
    %10 = arith.addf %8, %9 : vector<8x32xf32>
    %c0_6 = arith.constant 0 : index
    %c0_7 = arith.constant 0 : index
    %c0_8 = arith.constant 0 : index
    %11 = vector.load %arg3[%c0_6, %c0_7, %c0_8] : memref<1x8x1xf32, #tpu.memory_space<vmem>>, vector<1x8x1xf32>
    %12 = vector.shape_cast %11 : vector<1x8x1xf32> to vector<8x1xf32>
    %cst_9 = arith.constant 0.000000e+00 : f32
    %13 = vector.broadcast %cst_9 : f32 to vector<8x1xf32>
    %14 = arith.cmpf oeq, %12, %13 : vector<8x1xf32>
    %cst_10 = arith.constant 0.000000e+00 : f32
    %15 = vector.shape_cast %14 : vector<8x1xi1> to vector<8x1xi1>
    %16 = vector.broadcast %15 : vector<8x1xi1> to vector<8x32xi1>
    %17 = vector.broadcast %cst_10 : f32 to vector<8x32xf32>
    %18 = arith.select %16, %17, %10 : vector<8x32xi1>, vector<8x32xf32>
    %c0_11 = arith.constant 0 : index
    %c0_12 = arith.constant 0 : index
    %c0_13 = arith.constant 0 : index
    %19 = vector.load %arg6[%c0_11, %c0_12, %c0_13] : memref<1x8x32xf32, #tpu.memory_space<vmem>>, vector<1x8x32xf32>
    %20 = vector.shape_cast %19 : vector<1x8x32xf32> to vector<8x32xf32>
    %21 = vector.shape_cast %18 : vector<8x32xf32> to vector<1x8x32xf32>
    tpu.vector_store %arg6[%c0_11, %c0_12, %c0_13], %21 {strides = array<i32>} : memref<1x8x32xf32, #tpu.memory_space<vmem>>, vector<1x8x32xf32>,
    return
  }
  func.func @transform_0(%arg0: i32, %arg1: i32) -> (i32, i32, i32) {
    %c0_i32 = arith.constant 0 : i32
    %c0_i32_0 = arith.constant 0 : i32
    return %arg0, %arg1, %c0_i32 : i32, i32, i32
  }
  func.func @transform_1(%arg0: i32, %arg1: i32) -> (i32, i32, i32) {
    %c0_i32 = arith.constant 0 : i32
    %c0_i32_0 = arith.constant 0 : i32
    return %arg0, %arg1, %c0_i32 : i32, i32, i32
  }
  func.func @transform_2(%arg0: i32, %arg1: i32) -> (i32, i32) {
    %c0_i32 = arith.constant 0 : i32
    %c0_i32_0 = arith.constant 0 : i32
    %c0_i32_1 = arith.constant 0 : i32
    return %c0_i32, %c0_i32_0 : i32, i32
  }
  func.func @transform_3(%arg0: i32, %arg1: i32) -> (i32, i32) {
    %c0_i32 = arith.constant 0 : i32
    %c0_i32_0 = arith.constant 0 : i32
    return %arg1, %c0_i32 : i32, i32
  }
  func.func @transform_4(%arg0: i32, %arg1: i32) -> (i32, i32, i32) {
    %c0_i32 = arith.constant 0 : i32
    %c0_i32_0 = arith.constant 0 : i32
    return %arg0, %arg1, %c0_i32 : i32, i32, i32
  }
}

</mosaic_0001>

<bundles_post_ra>
// kernel: tpu_custom_call.1
= control target key start
LH: loop header
LB: loop body
LE: loop exit
PB: predicated region body
PF: predicated region fallthrough
CT: control target
= control target key end

     0   :  { %9 = vsyncpa [#allocation3], 0  ;;  %s961_s0 = inlined_call_operand.vmem [shape: s32[2,8,1], index: 0, kind: input, shape index: {}]   ;;  %s962_s1 = inlined_call_operand.vmem [shape: f32[2,8,1], index: 1, kind: input, shape index: {}]   ;;  %s963_s2 = inlined_call_operand.vmem [shape: f32[48,32], index: 2, kind: input, shape index: {}]   ;;  %s964_s3 = inlined_call_operand.vmem [shape: f32[8,32], index: 3, kind: input, shape index: {}]   ;;  %s965_s4 = inlined_call_operand.hbm [shape: f32[2,8,32], index: 4, kind: output, shape index: {}]  }
   0x1   :  { %11 = vsyncpa [#allocation3 + $0x1], 0  ;;  %s804_s15 = smov 0   ;;  %s806_s16 = smov 0  }
   0x2   :  { %s808_s17 = smov 0   ;;  %s810_s18 = smov 0  }
   0x3   :  { %s812_s19 = smov 0   ;;  %s814_s20 = smov 0  }
   0x4 LB: > { %s622_s21 = sadd.s32 4294967295, %s775_s20   ;;  %s623_s22 = sadd.s32 4294967294, %s775_s20   ;;  %s775_s20 = sphi %s814_s20, %s17_s20   ;;  %s771_s19 = sphi %s812_s19, %s972_s19   ;;  %s767_s18 = sphi %s810_s18, %s971_s18   ;;  %s763_s17 = sphi %s808_s17, %s970_s17   ;;  %s759_s16 = sphi %s806_s16, %s969_s16   ;;  %s755_s15 = sphi %s804_s15, %s968_s15  }
   0x5   : > { %s29_s23 = sadd.s32 1, %s771_s19  ;;  %s141_s24 = sadd.s32 1, %s763_s17 }
   0x6   : > { %p31_p0 = scmp.ge.s32.totalorder %s29_s23, 2  ;;  %p151_p1 = scmp.ne.s32.totalorder %s763_s17, %s759_s16 }
   0x7   : > { %p152_p2 = scmp.eq.s32.totalorder %s622_s21, 1  ;;  %p157_p3 = scmp.ne.s32.totalorder %s759_s16, %s755_s15 }
   0x8   : > { %s974_s23 = smov (%p31_p0, %s29_s23), 0  ;;  %p158_p5 = scmp.eq.s32.totalorder %s623_s22, 1 }
   0x9   : > { %p844_p4 = por %p152_p2, %p151_p1  ;;  %s136_s26 = ssub.s32 %s771_s19, %s974_s23 }
   0xa   : > { %p627_p6 = scmp.ge.s32.totalorder %s775_s20, 1  ;;  %p139_p7 = scmp.eq.s32.totalorder %s136_s26, 0 }
   0xb   : > { %p851_p8 = por %p158_p5, %p157_p3  ;;  %p206_p9 = scmp.lt.s32.totalorder %s775_s20, 3 }
   0xc   : > { %s857_s28 = scalar_select %p139_p7, %s763_s17, %s141_s24  }
   0xd   : > { %p207_p10 = pnand %p627_p6, %p206_p9 }
   0xe   : > { %p245_p11 = scmp.lt.s32.totalorder (!%p207_p10), %s767_s18, 1  ;;  %s242_s9 = sand.u32 (!%p207_p10), 1, %s759_s16  }
   0xf   : > { %210 = sbr.rel (%p207_p10) target bundleno = 294 (0x126), region = 36  ;;  %s628_s10 = sshll.u32 (!%p207_p10), %s242_s9, 3 }
  0x10   : > { %s636_s11 = sshll.u32 (!%p207_p10), %s767_s18, 3 }
  0x11   : > { %s516_s14 = scalar_lea.hbm (!%p207_p10), %s965_s4, %s636_s11 }
  0x12   : > { %s520_s24 = sshll.u32 (!%p207_p10), %s516_s14, 4  ;;  %s521_s24 = int_to_ptr.hbm [resolvable:$true] %s520_s24 }
  0x13   : > { %s711_s26 = sshra.s32 (!%p207_p10), %s521_s24, 4  ;;  %s712_s26 = int_to_ptr.hbm [resolvable:$true] %s711_s26 }
  0x14   : > { %v277_v0 = vld [vmem:[%s963_s2 + $0x28] sm:$0xff]  ;;  %v276_v1 = vld [vmem:[%s963_s2 + $0x20] sm:$0xff]  ;;  %v275_v2 = vld [vmem:[%s963_s2 + $0x18] sm:$0xff]  ;;  %v777_v3 = vmov 0   ;;  %s246_s21 = scalar_select %p245_p11, %s767_s18, 1  ;;  %v264_v40 = vlaneseq  ;;  %vm279_vm1 = vcmask 392192  }
  0x15   : > { %696 = vset.pattern.permute.xlu0 %v777_v3  ;;  %v869_v4 = vand.u32 4294901760, %v277_v0  ;;  %v871_v5 = vand.u32 4294901760, %v276_v1  ;;  %v873_v6 = vand.u32 4294901760, %v275_v2  ;;  %v274_v7 = vld [vmem:[%s963_s2 + $0x10] sm:$0xff]  ;;  %v273_v8 = vld [vmem:[%s963_s2 + $0x8] sm:$0xff]  ;;  %v272_v9 = vld [vmem:[%s963_s2] sm:$0xff]  ;;  %p718_p1 = scmp.lt.s32.totalorder %s712_s26, %s965_s4 }
  0x16   : > { %v885_v10 = vand.u32 4294901760, %v274_v7  ;;  %v887_v11 = vand.u32 4294901760, %v273_v8  ;;  %v889_v12 = vand.u32 4294901760, %v272_v9  ;;  %s629_s22 = sshll.u32 %s246_s21, 3  ;;  %v265_v41 = vand.u32 127, %v264_v40  ;;  %v278_v50 = vld [vmem:[%s964_s3] sm:$0xff] }
  0x17   : > { %v325_v13 = vsub.f32 %v277_v0, %v869_v4  ;;  %v331_v14 = vsub.f32 %v276_v1, %v871_v5  ;;  %v337_v15 = vsub.f32 %v275_v2, %v873_v6  ;;  %410 = vmatpush.msra.mxu3 %v869_v4  ;;  %294 = vmatpush.msra.mxu0 %v869_v4  ;;  %s258_s29 = scalar_lea.vmem %s962_s1, %s629_s22  ;;  %s251_s6 = scalar_lea.vmem %s961_s0, %s629_s22  ;;  %v778_v43 = vmov 0.0  }
  0x18   : > { %v343_v16 = vsub.f32 %v274_v7, %v885_v10  ;;  %v349_v17 = vsub.f32 %v273_v8, %v887_v11  ;;  %v355_v18 = vsub.f32 %v272_v9, %v889_v12  ;;  %v494_v22 = vld [vmem:[%s258_s29] sm:$0xff]  ;;  %s244_s21 = scalar_lea.vmem [#allocation2], %s628_s10  ;;  %vm502_vm3 = vcmask 261120   ;;  %s505_s18 = scalar_lea.sflag [#allocation3], %s242_s9 }
  0x19   : > { %v326_v19 = vand.u32 4294901760, %v325_v13  ;;  %v332_v20 = vand.u32 4294901760, %v331_v14  ;;  %v338_v21 = vand.u32 4294901760, %v337_v15  ;;  %377 = vmatpush.msra.mxu2 %v325_v13  ;;  %412 = vmatpush.msra.mxu3 %v871_v5  ;;  %v263_v23 = vld [vmem:[%s251_s6] sm:$0xff]  ;;  %vm495_vm0 = vcmp.eq.f32.partialorder %v494_v22, 0.0  ;;  %s518_s22 = sshll.u32 %s244_s21, 4  ;;  %s519_s22 = int_to_ptr.vmem [resolvable:$true] %s518_s22 }
  0x1a   : > { %v344_v24 = vand.u32 4294901760, %v343_v16  ;;  %296 = vmatpush.msra.mxu0 %v871_v5  ;;  %267 = vperm.xlu0 %696, %v263_v23   ;;  %v350_v28 = vand.u32 4294901760, %v349_v17  ;;  %v356_v29 = vand.u32 4294901760, %v355_v18  ;;  %v496_v35 = vsel %vm495_vm0, 1, %v777_v3  ;;  %s713_s29 = scalar_lea.hbm %s712_s26, 8  ;;  %s717_s6 = scalar_lea.hbm %s965_s4, 16 }
  0x1b   : > { %v327_v25 = vsub.f32 %v325_v13, %v326_v19  ;;  %v333_v26 = vsub.f32 %v331_v14, %v332_v20  ;;  %v339_v27 = vsub.f32 %v337_v15, %v338_v21  ;;  %380 = vmatpush.msra.mxu2 %v331_v14  ;;  %414 = vmatpush.msra.mxu3 %v873_v6  ;;  %p714_p12 = scmp.ne.s32.totalorder %s712_s26, %s713_s29  ;;  %p719_p2 = scmp.lt.s32.totalorder %s717_s6, %s713_s29 }
  0x1c   : > { %298 = vmatpush.msra.mxu0 %v873_v6  ;;  %v345_v32 = vsub.f32 %v343_v16, %v344_v24  ;;  %v351_v34 = vsub.f32 %v349_v17, %v350_v28  ;;  %v357_v37 = vsub.f32 %v355_v18, %v356_v29 }
  0x1d   : > { %v328_v30 = vand.u32 4294901760, %v327_v25  ;;  %v334_v31 = vand.u32 4294901760, %v333_v26  ;;  %383 = vmatpush.msra.mxu2 %v337_v15  ;;  %416 = vmatpush.msra.mxu3 %v885_v10  ;;  %v340_v33 = vand.u32 4294901760, %v339_v27  ;;  %p715_p13 = pnand %p714_p12, %p844_p4  ;;  %p720_p3 = por %p719_p2, %p718_p1 }
  0x1e   : > { %300 = vmatpush.msra.mxu0 %v885_v10  ;;  %v346_v36 = vand.u32 4294901760, %v345_v32  ;;  %v352_v38 = vand.u32 4294901760, %v351_v34  ;;  %v358_v39 = vand.u32 4294901760, %v357_v37 }
  0x1f   : > { %329 = vmatpush.msra.mxu1 %v328_v30  ;;  %386 = vmatpush.msra.mxu2 %v343_v16  ;;  %p716_p0 = pneg %p715_p13 }
  0x20   : > { %418 = vmatpush.msra.mxu3 %v887_v11  ;;  %302 = vmatpush.msra.mxu0 %v887_v11 }
  0x21   : > { %335 = vmatpush.msra.mxu1 %v334_v31  ;;  %389 = vmatpush.msra.mxu2 %v349_v17  ;;  %p721_p5 = pnand %p720_p3, %p716_p0 }
  0x22   : > { %420 = vmatpush.msra.mxu3 %v889_v12  ;;  %304 = vmatpush.msra.mxu0 %v889_v12 }
  0x23   : > { %498 = vperm.xlu0 %696, %v496_v35   ;;  %341 = vmatpush.msra.mxu1 %v340_v33 }
  0x24   : > { %392 = vmatpush.msra.mxu2 %v355_v18  ;;  %441 = vmatpush.msrb.mxu0 %v326_v19 }
  0x25   : > { %347 = vmatpush.msra.mxu1 %v346_v36 }
  0x26   : > { %445 = vmatpush.msrb.mxu0 %v332_v20 }
  0x27   : > { %353 = vmatpush.msra.mxu1 %v352_v38 }
  0x28   : > { %449 = vmatpush.msrb.mxu0 %v338_v21 }
  0x29   : > { %359 = vmatpush.msra.mxu1 %v358_v39 }
  0x2a   : > { %453 = vmatpush.msrb.mxu0 %v344_v24 }
  0x2b   : > { %478 = vmatpush.msrb.mxu1 %v869_v4 }
  0x2c   : > { %457 = vmatpush.msrb.mxu0 %v350_v28 }
  0x2d   : > { %480 = vmatpush.msrb.mxu1 %v871_v5 }
  0x2e   : > { %461 = vmatpush.msrb.mxu0 %v356_v29 }
  0x2f   : > { %482 = vmatpush.msrb.mxu1 %v873_v6 }
  0x31   : > { %484 = vmatpush.msrb.mxu1 %v885_v10 }
  0x33   : > { %486 = vmatpush.msrb.mxu1 %v887_v11 }
  0x35   : > { %488 = vmatpush.msrb.mxu1 %v889_v12 }
  0x8c   : > { %v268_v42 = vpop.permute.xlu0 %267 }
  0x8d   : > { %vm269_vm2 = vcmp.eq.s32.totalorder %v268_v42, %v265_v41 }
  0x8e   : > { %v631_v44 = vsel %vm269_vm2, 1.0, %v778_v43 }
  0x8f   : > { %632 = vmatmul.msk.f32.vlgmr.msra.gmra.mxu1 %vm279_vm1, %v631_v44  ;;  %v281_v45 = vsel %vm279_vm1, %v631_v44, 0 }
  0x90   : > { %v306_v46 = vsub.f32 %v281_v45, %v281_v45 }
  0x92   : > { %395 = vmatmul.f32.vlgmr.msra.gmra.mxu2 %v306_v46  ;;  %v307_v47 = vand.u32 4294901760, %v306_v46 }
  0x94   : > { %424 = vmatmul.f32.vlgmr.msra.gmra.mxu3 %v307_v47  ;;  %v308_v48 = vsub.f32 %v306_v46, %v307_v47 }
  0x95   : > { %v499_v60 = vpop.permute.xlu0 %498 }
  0x96   : > { %v309_v49 = vand.u32 4294901760, %v308_v48  ;;  %vm500_vm4 = vcmp.eq.s32.totalorder %v499_v60, 1 }
  0x97   : > { %634 = vmatmul.msk.f32.vlgmr.msrb.gmra.mxu1 %vm279_vm1, %v631_v44 }
  0x98   : > { %310 = vmatmul.f32.vlgmr.msra.gmra.mxu0 %v309_v49 }
  0xa0   : > { %633 = vmatmul.msk.f32.vlgmr.msrb.gmra.mxu0 %vm279_vm1, %v631_v44 }
 0x10c   : > { %v362_v51 = vpop.f32.mrf.mxu1 }
 0x114   : > { %v491_v62 = vpop.f32.mrf.mxu1 }
 0x115   : > { %v311_v52 = vpop.f32.mrf.mxu0  ;;  %v396_v55 = vpop.f32.mrf.mxu2 }
 0x116   : > { %v312_v53 = vadd.f32 %v311_v52, %v278_v50 }
 0x117   : > { %v425_v57 = vpop.f32.mrf.mxu3 }
 0x118   : > { %v363_v54 = vadd.f32 %v362_v51, %v312_v53 }
 0x11a   : > { %v397_v56 = vadd.f32 %v396_v55, %v363_v54 }
 0x11c   : > { %v426_v58 = vadd.f32 %v425_v57, %v397_v56 }
 0x11d   : > { %v464_v59 = vpop.f32.mrf.mxu0 }
 0x11e   : > { %v465_v61 = vadd.f32 %v464_v59, %v426_v58 }
 0x120   : > { %v492_v63 = vadd.f32 %v491_v62, %v465_v61 }
 0x122   : > { %v501_v0 = vsel %vm500_vm4, 0.0, %v492_v63 }
 0x123   : > { %503 = vst.msk [vmem:[%s244_s21] sm:$0xff] %vm502_vm3, %v501_v0 }
 0x124   : > { %724 = shalt.err (!%p721_p5)
}
 0x125   : > { %639 = dma.vmem_to_hbm [thread:$0]  (%p844_p4), %s519_s22, 128, %s521_s24, %s505_s18  }
 0x126 PF: > { %p645_p6 = scmp.ge.s32.totalorder %s775_s20, 2  ;;  %s532_s9 = sand.u32 1, %s755_s15  }
 0x127   : > { %s533_s10 = scalar_lea.sflag [#allocation3], %s532_s9 }
 0x128   : > { %p642_p7 = pnand %p645_p6, %p851_p8 }
 0x12a   : > { %p643_p9 = pneg %p642_p7 }
 0x12c   : > { %750 = dma.done.wait (%p643_p9), %s533_s10, 128  }
 0x12d   : > { %752 = vsyncadd (%p643_p9), %s533_s10, 4294967168  ;;  %s17_s20 = sadd.s32 1, %s775_s20   ;;  %s968_s15 = smov %s759_s16 }
 0x12e   : > { %p14_p10 = scmp.ge.s32.totalorder %s17_s20, 4   ;;  %s969_s16 = smov %s763_s17 }
 0x12f   : > { %s970_s17 = smov %s857_s28  ;;  %s971_s18 = smov %s771_s19 }
 0x130   : > { %s972_s19 = smov %s974_s23  ;;  %16 = sbr.rel (!%p14_p10) target bundleno = 4 (0x4), region = 77 }
 0x135   :  { %539 = vsyncpa [#allocation3], 1 }
 0x136   :  { %541 = vsyncpa [#allocation3 + $0x1], 1 }

</bundles_post_ra>
